<compile_context>
chip_gen: v7x
topology: tpu7x:2x2x1
jax: 0.10.0
libtpu: 0.0.40
codegen_flags: <defaults>
</compile_context>

<pallas_src>
import functools

import jax
import jax.numpy as jnp
from jax.experimental import pallas as pl
from jax.experimental.pallas import tpu as pltpu

KH, KW, STRIDE, PAD = 4, 4, 2, 1
BN_EPS = 1e-5
LEAKY_SLOPE = 0.2
LANE = 128
DEFAULT_TILE_M = 512  # 512-1024 hits ~85% of HBM roofline; sized for v7x 64MiB VMEM.


def _round_up(x, m):
    return ((x + m - 1) // m) * m


# --------------------------------------------------------------------------
# Pass 1: conv (as matmul) + bias, plus per-channel sum / sum-of-squares.
# --------------------------------------------------------------------------
def conv_stats_kernel(patches_ref, w_ref, bias_ref, y_ref, stats_ref, *,
                      m_real, tile_m, m_padded):
    i = pl.program_id(0)

    @pl.when(i == 0)
    def _():
        stats_ref[...] = jnp.zeros_like(stats_ref)

    # Convolution as an MXU matmul: bf16 operands, f32 accumulation.
    y = jnp.dot(patches_ref[...], w_ref[...],
                preferred_element_type=jnp.float32)
    y = y + bias_ref[...]
    y_ref[...] = y

    # BatchNorm statistics must be over the *real* M rows only. Zero-padded
    # patch rows would otherwise contribute `bias` to the statistics.
    if m_padded != m_real:
        row = i * tile_m + jax.lax.broadcasted_iota(jnp.int32, (tile_m, 1), 0)
        valid = (row < m_real).astype(jnp.float32)
        yv = y * valid
    else:
        yv = y
    s = jnp.sum(yv, axis=0, keepdims=True)
    ss = jnp.sum(yv * yv, axis=0, keepdims=True)
    stats_ref[...] += jnp.concatenate([s, ss], axis=0)


# --------------------------------------------------------------------------
# Pass 2: per-channel affine (folded BatchNorm) + LeakyReLU. Fully parallel.
# --------------------------------------------------------------------------
def bn_lrelu_kernel(y_ref, ab_ref, out_ref):
    y = y_ref[...]
    z = y * ab_ref[0:1, :] + ab_ref[1:2, :]
    out_ref[...] = jnp.where(z >= 0, z, LEAKY_SLOPE * z)


def im2col(x):
    """x: (N, Cin, H, W) -> (N*OH*OW, Cin*KH*KW), plus (OH, OW).

    Column order is cin*KH*KW + kh*KW + kw, matching PyTorch's
    (Cout, Cin, KH, KW) weight layout.
    """
    n, c, h, w = x.shape
    oh = (h + 2 * PAD - KH) // STRIDE + 1
    ow = (w + 2 * PAD - KW) // STRIDE + 1
    xp = jnp.pad(x, ((0, 0), (0, 0), (PAD, PAD), (PAD, PAD)))
    cols = []
    for i in range(KH):
        for j in range(KW):
            cols.append(xp[:, :, i:i + STRIDE * oh:STRIDE,
                           j:j + STRIDE * ow:STRIDE])
    # (KH*KW, N, C, OH, OW) -> (N, OH, OW, C, KH, KW)
    p = jnp.stack(cols, axis=0).reshape(KH, KW, n, c, oh, ow)
    p = p.transpose(2, 4, 5, 3, 0, 1)
    return p.reshape(n * oh * ow, c * KH * KW), oh, ow


def conv_class_forward(x, weight, bias, gamma, beta, *, tile_m=DEFAULT_TILE_M):
    """x: (N, Cin, H, W). weight: (Cout, Cin, KH, KW). Returns (N, Cout, OH, OW)."""
    n, cin, h, w = x.shape
    cout = weight.shape[0]

    # im2col in bf16 (halves HBM bytes of the expanded patch stream).
    patches, oh, ow = im2col(x.astype(jnp.bfloat16))
    m, k = patches.shape

    cout_p = _round_up(cout, LANE)
    tile_m = min(tile_m, _round_up(m, 8))
    m_pad = _round_up(m, tile_m)
    grid_m = m_pad // tile_m

    # Zero-padded, lane-dense operands.
    patches_b = jnp.pad(patches, ((0, m_pad - m), (0, 0)))
    w_mat = jnp.pad(weight.reshape(cout, cin * KH * KW).T.astype(jnp.bfloat16),
                    ((0, 0), (0, cout_p - cout)))
    bias_row = jnp.pad(bias.astype(jnp.float32).reshape(1, cout),
                       ((0, 0), (0, cout_p - cout)))
    gamma_p = jnp.pad(gamma.astype(jnp.float32), (0, cout_p - cout))
    beta_p = jnp.pad(beta.astype(jnp.float32), (0, cout_p - cout))

    kernel1 = functools.partial(conv_stats_kernel,
                                m_real=m, tile_m=tile_m, m_padded=m_pad)

    y_full, stats = pl.pallas_call(
        kernel1,
        out_shape=(
            jax.ShapeDtypeStruct((m_pad, cout_p), jnp.float32),  # y = conv + bias
            jax.ShapeDtypeStruct((2, cout_p), jnp.float32),      # [sum; sumsq]
        ),
        grid_spec=pltpu.PrefetchScalarGridSpec(
            num_scalar_prefetch=0,
            grid=(grid_m,),
            in_specs=[
                pl.BlockSpec((tile_m, k), lambda i: (i, 0)),     # patches tile
                pl.BlockSpec((k, cout_p), lambda i: (0, 0)),     # weights (resident)
                pl.BlockSpec((1, cout_p), lambda i: (0, 0)),     # bias (resident)
            ],
            out_specs=[
                pl.BlockSpec((tile_m, cout_p), lambda i: (i, 0)),
                pl.BlockSpec((2, cout_p), lambda i: (0, 0)),     # stats accumulator
            ],
        ),
        compiler_params=pltpu.CompilerParams(
            dimension_semantics=("arbitrary",)),
        cost_estimate=pl.CostEstimate(
            flops=2 * m_pad * k * cout_p,
            transcendentals=0,
            bytes_accessed=(m_pad * k * 2 + k * cout_p * 2
                            + m_pad * cout_p * 4 + 2 * cout_p * 4)),
    )(patches_b, w_mat, bias_row)

    # Fold batch statistics (PyTorch training mode: biased variance over
    # N*OH*OW) into a per-channel affine z = a*y + b. Tiny (Cout,)-sized math.
    mean = stats[0, :] / jnp.float32(m)
    var = jnp.maximum(stats[1, :] / jnp.float32(m) - mean * mean, 0.0)
    a = gamma_p * jax.lax.rsqrt(var + BN_EPS)
    b = beta_p - mean * a
    ab = jnp.stack([a, b], axis=0)  # (2, cout_p)

    out_mat = pl.pallas_call(
        bn_lrelu_kernel,
        out_shape=jax.ShapeDtypeStruct((m_pad, cout_p), jnp.float32),
        grid_spec=pltpu.PrefetchScalarGridSpec(
            num_scalar_prefetch=0,
            grid=(grid_m,),
            in_specs=[
                pl.BlockSpec((tile_m, cout_p), lambda i: (i, 0)),
                pl.BlockSpec((2, cout_p), lambda i: (0, 0)),
            ],
            out_specs=pl.BlockSpec((tile_m, cout_p), lambda i: (i, 0)),
        ),
        compiler_params=pltpu.CompilerParams(
            dimension_semantics=("parallel",)),  # both TCs on v7x
        cost_estimate=pl.CostEstimate(
            flops=3 * m_pad * cout_p,
            transcendentals=0,
            bytes_accessed=2 * m_pad * cout_p * 4),
    )(y_full, ab)

    # Slice off channel/row padding; (M, Cout) -> (N, OH, OW, Cout) -> NCHW to
    # match the PyTorch module's output layout.
    out = out_mat[:m, :cout].reshape(n, oh, ow, cout).transpose(0, 3, 1, 2)
    return out


def reference_forward(x, weight, bias, gamma, beta):
    """Pure-JAX reference with matching precision (bf16 operands, f32 accum)."""
    y = jax.lax.conv_general_dilated(
        x.astype(jnp.bfloat16), weight.astype(jnp.bfloat16),
        window_strides=(STRIDE, STRIDE), padding=((PAD, PAD), (PAD, PAD)),
        dimension_numbers=("NCHW", "OIHW", "NCHW"),
        preferred_element_type=jnp.float32,
    ) + bias.astype(jnp.float32).reshape(1, -1, 1, 1)
    mean = jnp.mean(y, axis=(0, 2, 3), keepdims=True)
    var = jnp.mean((y - mean) ** 2, axis=(0, 2, 3), keepdims=True)
    y_hat = (y - mean) * jax.lax.rsqrt(var + BN_EPS)
    z = y_hat * gamma.reshape(1, -1, 1, 1) + beta.reshape(1, -1, 1, 1)
    return jnp.where(z >= 0, z, LEAKY_SLOPE * z)


if __name__ == "__main__":
    # Small shapes consistent with the module: nin=4, nout=8, 16x16 spatial.
    N, NIN, NOUT, H, W = 2, 4, 8, 16, 16

    key = jax.random.PRNGKey(0)
    k_x, k_w, k_b = jax.random.split(key, 3)

    x = jax.random.normal(k_x, (N, NIN, H, W), dtype=jnp.float32)

    # Deterministic parameter init (shapes match nn.Conv2d(nin, nout, 4, 2, 1)
    # and nn.BatchNorm2d(nout) defaults: gamma=1, beta=0).
    fan_in = NIN * KH * KW
    w_scale = 1.0 / (fan_in ** 0.5)
    weight = jax.random.uniform(k_w, (NOUT, NIN, KH, KW),
                                minval=-w_scale, maxval=w_scale,
                                dtype=jnp.float32)
    bias = jax.random.uniform(k_b, (NOUT,), minval=-w_scale, maxval=w_scale,
                              dtype=jnp.float32)
    gamma = jnp.ones((NOUT,), dtype=jnp.float32)
    beta = jnp.zeros((NOUT,), dtype=jnp.float32)

    out = conv_class_forward(x, weight, bias, gamma, beta)
    out = jax.block_until_ready(out)

    ref = reference_forward(x, weight, bias, gamma, beta)
    assert out.shape == (N, NOUT, H // 2, W // 2), out.shape
    max_err = float(jnp.max(jnp.abs(out - ref)))
    assert jnp.allclose(out, ref, atol=2e-3, rtol=2e-3), max_err

    print("KERNEL_OK")
</pallas_src>

<mosaic_0001>
module attributes {stable_mosaic.version = 11 : i64} {
  func.func @conv_stats_kernel(%arg0: i32, %arg1: memref<128x64xbf16, #tpu.memory_space<vmem>>, %arg2: memref<64x128xbf16, #tpu.memory_space<vmem>>, %arg3: memref<1x128xf32, #tpu.memory_space<vmem>>, %arg4: memref<128x128xf32, #tpu.memory_space<vmem>>, %arg5: memref<2x128xf32, #tpu.memory_space<vmem>>) attributes {dimension_semantics = [#tpu.dimension_semantics<arbitrary>], iteration_bounds = array<i64: 1>, scalar_prefetch = 0 : i64, scratch_operands = 0 : i64, tpu.core_type = #tpu.core_type<tc>, window_params = [{transform_indices = @transform_0, window_bounds = array<i64: 128, 64>}, {pipeline_mode = #tpu.pipeline_mode<synchronous>, transform_indices = @transform_1, window_bounds = array<i64: 64, 128>}, {pipeline_mode = #tpu.pipeline_mode<synchronous>, transform_indices = @transform_2, window_bounds = array<i64: 1, 128>}, {transform_indices = @transform_3, window_bounds = array<i64: 128, 128>}, {pipeline_mode = #tpu.pipeline_mode<synchronous>, transform_indices = @transform_4, window_bounds = array<i64: 2, 128>}]} {
    %c0_i32 = arith.constant 0 : i32
    %0 = arith.cmpi eq, %arg0, %c0_i32 : i32
    %1 = arith.extui %0 : i1 to i32
    %c0_i32_0 = arith.constant 0 : i32
    %2 = arith.cmpi ne, %1, %c0_i32_0 : i32
    scf.if %2 {
      %cst_14 = arith.constant 0.000000e+00 : f32
      %19 = vector.broadcast %cst_14 : f32 to vector<2x128xf32>
      %c0_15 = arith.constant 0 : index
      %c0_16 = arith.constant 0 : index
      %20 = vector.load %arg5[%c0_15, %c0_16] : memref<2x128xf32, #tpu.memory_space<vmem>>, vector<2x128xf32>
      tpu.vector_store %arg5[%c0_15, %c0_16], %19 {strides = array<i32>} : memref<2x128xf32, #tpu.memory_space<vmem>>, vector<2x128xf32>,
    } else {
    }
    %c0 = arith.constant 0 : index
    %c0_1 = arith.constant 0 : index
    %3 = vector.load %arg1[%c0, %c0_1] : memref<128x64xbf16, #tpu.memory_space<vmem>>, vector<128x64xbf16>
    %c0_2 = arith.constant 0 : index
    %c0_3 = arith.constant 0 : index
    %4 = vector.load %arg2[%c0_2, %c0_3] : memref<64x128xbf16, #tpu.memory_space<vmem>>, vector<64x128xbf16>
    %cst = arith.constant dense<0.000000e+00> : vector<128x128xf32>
    %5 = tpu.matmul %3, %4, %cst {dimension_numbers = #tpu.dot_dimension_numbers<[1], [0], [0], [1], [0, 0, 1, 1], [], []>} : vector<128x64xbf16>, vector<64x128xbf16>, vector<128x128xf32> -> vector<128x128xf32>
    %c0_4 = arith.constant 0 : index
    %c0_5 = arith.constant 0 : index
    %6 = vector.load %arg3[%c0_4, %c0_5] : memref<1x128xf32, #tpu.memory_space<vmem>>, vector<1x128xf32>
    %7 = vector.broadcast %6 : vector<1x128xf32> to vector<128x128xf32>
    %8 = arith.addf %5, %7 : vector<128x128xf32>
    %c0_6 = arith.constant 0 : index
    %c0_7 = arith.constant 0 : index
    %9 = vector.load %arg4[%c0_6, %c0_7] : memref<128x128xf32, #tpu.memory_space<vmem>>, vector<128x128xf32>
    tpu.vector_store %arg4[%c0_6, %c0_7], %8 {strides = array<i32>} : memref<128x128xf32, #tpu.memory_space<vmem>>, vector<128x128xf32>,
    %cst_8 = arith.constant dense<0.000000e+00> : vector<128xf32>
    %10 = vector.multi_reduction <add>, %8, %cst_8 [0] : vector<128x128xf32> to vector<128xf32>
    %11 = vector.shape_cast %10 : vector<128xf32> to vector<1x128xf32>
    %12 = arith.mulf %8, %8 : vector<128x128xf32>
    %cst_9 = arith.constant dense<0.000000e+00> : vector<128xf32>
    %13 = vector.multi_reduction <add>, %12, %cst_9 [0] : vector<128x128xf32> to vector<128xf32>
    %14 = vector.shape_cast %13 : vector<128xf32> to vector<1x128xf32>
    %c0_10 = arith.constant 0 : index
    %c0_11 = arith.constant 0 : index
    %15 = vector.load %arg5[%c0_10, %c0_11] : memref<2x128xf32, #tpu.memory_space<vmem>>, vector<2x128xf32>
    %16 = tpu.concatenate %11, %14 in 0 : vector<1x128xf32>, vector<1x128xf32> -> vector<2x128xf32>
    %17 = arith.addf %15, %16 : vector<2x128xf32>
    %c0_12 = arith.constant 0 : index
    %c0_13 = arith.constant 0 : index
    %18 = vector.load %arg5[%c0_12, %c0_13] : memref<2x128xf32, #tpu.memory_space<vmem>>, vector<2x128xf32>
    tpu.vector_store %arg5[%c0_12, %c0_13], %17 {strides = array<i32>} : memref<2x128xf32, #tpu.memory_space<vmem>>, vector<2x128xf32>,
    return
  }
  func.func @transform_0(%arg0: i32) -> (i32, i32) {
    %c0_i32 = arith.constant 0 : i32
    %c0_i32_0 = arith.constant 0 : i32
    return %arg0, %c0_i32 : i32, i32
  }
  func.func @transform_1(%arg0: i32) -> (i32, i32) {
    %c0_i32 = arith.constant 0 : i32
    %c0_i32_0 = arith.constant 0 : i32
    %c0_i32_1 = arith.constant 0 : i32
    return %c0_i32, %c0_i32_0 : i32, i32
  }
  func.func @transform_2(%arg0: i32) -> (i32, i32) {
    %c0_i32 = arith.constant 0 : i32
    %c0_i32_0 = arith.constant 0 : i32
    %c0_i32_1 = arith.constant 0 : i32
    return %c0_i32, %c0_i32_0 : i32, i32
  }
  func.func @transform_3(%arg0: i32) -> (i32, i32) {
    %c0_i32 = arith.constant 0 : i32
    %c0_i32_0 = arith.constant 0 : i32
    return %arg0, %c0_i32 : i32, i32
  }
  func.func @transform_4(%arg0: i32) -> (i32, i32) {
    %c0_i32 = arith.constant 0 : i32
    %c0_i32_0 = arith.constant 0 : i32
    %c0_i32_1 = arith.constant 0 : i32
    return %c0_i32, %c0_i32_0 : i32, i32
  }
}

</mosaic_0001>

<bundles_post_ra>
// kernel: tpu_custom_call.1
= control target key start
LH: loop header
LB: loop body
LE: loop exit
PB: predicated region body
PF: predicated region fallthrough
CT: control target
= control target key end

     0   :  { %10 = vsyncpa [#allocation3], 0  ;;  %vm119_vm0 = vcmask 523264   ;;  %s611_s0 = inlined_call_operand.vmem [shape: bf16[128,64], index: 0, kind: input, shape index: {}]   ;;  %s612_s1 = inlined_call_operand.vmem [shape: bf16[64,128], index: 1, kind: input, shape index: {}]   ;;  %s613_s2 = inlined_call_operand.vmem [shape: f32[1,128], index: 2, kind: input, shape index: {}]   ;;  %s614_s3 = inlined_call_operand.hbm [shape: f32[128,128], index: 3, kind: output, shape index: {0}]   ;;  %s615_s4 = inlined_call_operand.hbm [shape: f32[2,128], index: 4, kind: output, shape index: {1}]  }
   0x1   :  { %v420_v0 = vld [vmem:[%s612_s1] sm:$0xff]   ;;  %v421_v1 = vld [vmem:[%s612_s1 + $0x8] sm:$0xff]   ;;  %v422_v2 = vld [vmem:[%s612_s1 + $0x10] sm:$0xff]  }
   0x2   :  { %383 = vmatprep.subr.bf16.mxu0 %v420_v0  ;;  %407 = vmatprep.subr.bf16.mxu1 %v420_v0  ;;  %v424_v3 = vld [vmem:[%s611_s0] sm:$0xff]   ;;  %v423_v4 = vld [vmem:[%s612_s1 + $0x18] sm:$0xff]  }
   0x3   :  { %384 = vmatpush3.bf16.msra.mxu0 %v420_v0  ;;  %411 = vmatpush3.bf16.msra.mxu1 %v420_v0  ;;  %v428_v5 = vld [vmem:[%s611_s0 + $0x20] sm:$0xff]  }
   0x4   :  { %385 = vmatprep.subr.bf16.mxu0 %v421_v1  ;;  %408 = vmatprep.subr.bf16.mxu1 %v421_v1 }
   0x5   :  { %391 = vmatprep.mubr.msk.bf16.mxu0 %vm119_vm0, %v424_v3  ;;  %399 = vmatprep.mubr.msk.bf16.mxu1 %vm119_vm0, %v428_v5 }
   0x7   :  { %386 = vmatpush3.bf16.msra.mxu0 %v421_v1  ;;  %412 = vmatpush3.bf16.msra.mxu1 %v421_v1 }
   0x8   :  { %387 = vmatprep.subr.bf16.mxu0 %v422_v2  ;;  %409 = vmatprep.subr.bf16.mxu1 %v422_v2 }
   0xb   :  { %388 = vmatpush3.bf16.msra.mxu0 %v422_v2  ;;  %413 = vmatpush3.bf16.msra.mxu1 %v422_v2 }
   0xc   :  { %389 = vmatprep.subr.bf16.mxu0 %v423_v4  ;;  %410 = vmatprep.subr.bf16.mxu1 %v423_v4 }
   0xd   :  { %11 = vsyncpa [#allocation5], 0  ;;  %v425_v6 = vld [vmem:[%s611_s0 + $0x8] sm:$0xff]   ;;  %v426_v8 = vld [vmem:[%s611_s0 + $0x10] sm:$0xff]   ;;  %v480_v12 = vmov 0.0  }
   0xe   :  { %v429_v7 = vld [vmem:[%s611_s0 + $0x28] sm:$0xff]   ;;  %v430_v9 = vld [vmem:[%s611_s0 + $0x30] sm:$0xff]   ;;  %v427_v10 = vld [vmem:[%s611_s0 + $0x18] sm:$0xff]   ;;  %23 = vst [vmem:[#allocation4] sm:$0x3] %v480_v12 }
   0xf   :  { %390 = vmatpush3.bf16.msra.mxu0 %v423_v4  ;;  %414 = vmatpush3.bf16.msra.mxu1 %v423_v4  ;;  %v431_v11 = vld [vmem:[%s611_s0 + $0x38] sm:$0xff]   ;;  %v350_v13 = vld [vmem:[%s613_s2] ss:$0 sm:$0xff]  ;;  %s481_s0 = smov [#allocation2]  }
  0x10   :  { %s325_s2 = sshll.u32 %s481_s0, 4  ;;  %s326_s2 = int_to_ptr.vmem [resolvable:$true] %s325_s2 }
  0x11   :  { %s432_s14 = scalar_lea.vmem %s326_s2, 2048  ;;  %p437_p1 = scmp.lt.s32.totalorder %s326_s2, %s326_s2 }
  0x12   :  { %392 = vmatmul.mubr.msk.bf16.vlgmr.msra.gmra.mrb[0].mxu0 %vm119_vm0, %v425_v6  ;;  %400 = vmatmul.mubr.msk.bf16.vlgmr.msra.gmra.mrb[0].mxu1 %vm119_vm0, %v429_v7  ;;  %p433_p0 = scmp.ne.s32.totalorder %s326_s2, %s432_s14  ;;  %p438_p2 = scmp.lt.s32.totalorder %s432_s14, %s432_s14 }
  0x13   :  { %395 = vmatprep.mubr.msk.bf16.mxu0 %vm119_vm0, %v426_v8  ;;  %403 = vmatprep.mubr.msk.bf16.mxu1 %vm119_vm0, %v430_v9 }
  0x14   :  { %p439_p3 = por %p438_p2, %p437_p1 }
  0x16   :  { %p440_p4 = pnand %p439_p3, %p433_p0 }
  0x1a   :  { %396 = vmatmul.mubr.msk.bf16.gmra.mrb[4].mxu0 %vm119_vm0, %v427_v10  ;;  %404 = vmatmul.mubr.msk.bf16.gmra.mrb[4].mxu1 %vm119_vm0, %v431_v11 }
  0xe5   :  { %v393_v14 = vpop.f32.mrb[0].mxu0  ;;  %v401_v15 = vpop.f32.mrb[0].mxu1 }
  0xe6   :  { %v187_v16 = vadd.f32 %v393_v14, %v350_v13  ;;  %v178_v17 = vpop.f32.mrb[1].mxu0  ;;  %v557_v18 = vadd.f32 %v401_v15, %v350_v13  ;;  %v210_v19 = vpop.f32.mrb[1].mxu1 }
  0xe7   :  { %v179_v20 = vadd.f32 %v350_v13, %v178_v17  ;;  %v394_v21 = vpop.f32.mrb[2].mxu0  ;;  %v559_v22 = vadd.f32 %v350_v13, %v210_v19  ;;  %v402_v23 = vpop.f32.mrb[2].mxu1 }
  0xe8   :  { %243 = vst [vmem:[#allocation2 + $0x10] sm:$0xff] %v187_v16  ;;  %v190_v24 = vadd.f32 %v394_v21, %v350_v13  ;;  %v181_v25 = vpop.f32.mrb[3].mxu0  ;;  %251 = vst [vmem:[#allocation2 + $0x50] sm:$0xff] %v557_v18  ;;  %v562_v26 = vadd.f32 %v402_v23, %v350_v13  ;;  %v213_v27 = vpop.f32.mrb[3].mxu1  ;;  %v280_v33 = vmul.f32 %v187_v16, %v187_v16 }
  0xe9   :  { %241 = vst [vmem:[#allocation2] sm:$0xff] %v179_v20  ;;  %v182_v28 = vadd.f32 %v350_v13, %v181_v25  ;;  %249 = vst [vmem:[#allocation2 + $0x40] sm:$0xff] %v559_v22  ;;  %v565_v29 = vadd.f32 %v350_v13, %v213_v27  ;;  %v278_v30 = vmul.f32 %v179_v20, %v179_v20 }
  0xea   :  { %244 = vst [vmem:[#allocation2 + $0x18] sm:$0xff] %v190_v24  ;;  %252 = vst [vmem:[#allocation2 + $0x58] sm:$0xff] %v562_v26  ;;  %v281_v38 = vmul.f32 %v190_v24, %v190_v24 }
  0xeb   :  { %242 = vst [vmem:[#allocation2 + $0x8] sm:$0xff] %v182_v28  ;;  %v257_v31 = vadd.f32 %v182_v28, %v179_v20  ;;  %v279_v32 = vmul.f32 %v182_v28, %v182_v28  ;;  %250 = vst [vmem:[#allocation2 + $0x48] sm:$0xff] %v565_v29 }
  0xed   :  { %v258_v34 = vadd.f32 %v257_v31, %v187_v16  ;;  %v294_v35 = vadd.f32 %v279_v32, %v278_v30  ;;  %v397_v36 = vpop.f32.mrb[4].mxu0  ;;  %v405_v37 = vpop.f32.mrb[4].mxu1 }
  0xee   :  { %v203_v39 = vadd.f32 %v397_v36, %v350_v13  ;;  %v194_v40 = vpop.f32.mrb[5].mxu0  ;;  %v569_v41 = vadd.f32 %v405_v37, %v350_v13  ;;  %v226_v42 = vpop.f32.mrb[5].mxu1 }
  0xef   :  { %v295_v43 = vadd.f32 %v294_v35, %v280_v33  ;;  %v195_v44 = vadd.f32 %v350_v13, %v194_v40  ;;  %v259_v45 = vadd.f32 %v258_v34, %v190_v24  ;;  %v398_v46 = vpop.f32.mrb[6].mxu0  ;;  %v227_v47 = vadd.f32 %v350_v13, %v226_v42  ;;  %v406_v48 = vpop.f32.mrb[6].mxu1 }
  0xf0   :  { %247 = vst [vmem:[#allocation2 + $0x30] sm:$0xff] %v203_v39  ;;  %v206_v49 = vadd.f32 %v398_v46, %v350_v13  ;;  %v197_v50 = vpop.f32.mrb[7].mxu0  ;;  %255 = vst [vmem:[#allocation2 + $0x70] sm:$0xff] %v569_v41  ;;  %v238_v51 = vadd.f32 %v406_v48, %v350_v13  ;;  %v229_v52 = vpop.f32.mrb[7].mxu1  ;;  %v284_v61 = vmul.f32 %v203_v39, %v203_v39 }
  0xf1   :  { %245 = vst [vmem:[#allocation2 + $0x20] sm:$0xff] %v195_v44  ;;  %v260_v53 = vadd.f32 %v259_v45, %v195_v44  ;;  %v282_v54 = vmul.f32 %v195_v44, %v195_v44  ;;  %v296_v55 = vadd.f32 %v295_v43, %v281_v38  ;;  %v198_v56 = vadd.f32 %v350_v13, %v197_v50 }
  0xf2   :  { %253 = vst [vmem:[#allocation2 + $0x60] sm:$0xff] %v227_v47  ;;  %248 = vst [vmem:[#allocation2 + $0x38] sm:$0xff] %v206_v49  ;;  %v230_v57 = vadd.f32 %v350_v13, %v229_v52 }
  0xf3   :  { %256 = vst [vmem:[#allocation2 + $0x78] sm:$0xff] %v238_v51  ;;  %v297_v58 = vadd.f32 %v296_v55, %v282_v54  ;;  %246 = vst [vmem:[#allocation2 + $0x28] sm:$0xff] %v198_v56  ;;  %v261_v59 = vadd.f32 %v260_v53, %v198_v56  ;;  %v283_v60 = vmul.f32 %v198_v56, %v198_v56 }
  0xf4   :  { %254 = vst [vmem:[#allocation2 + $0x68] sm:$0xff] %v230_v57 }
  0xf5   :  { %v262_v62 = vadd.f32 %v261_v59, %v203_v39  ;;  %v298_v63 = vadd.f32 %v297_v58, %v283_v60 }
  0xf6   :  { %443 = shalt.err (!%p440_p4)
}
  0xf7   :  { %s444_s17 = scalar_lea.hbm %s614_s3, 2048 }
  0xf8   :  { %p445_p5 = scmp.ne.s32.totalorder %s614_s3, %s444_s17  ;;  %p448_p6 = scmp.lt.u32.totalorder %s444_s17, %s614_s3 }
  0xfa   :  { %p450_p7 = pnand %p448_p6, %p445_p5 }
  0xfc   :  { %453 = shalt.err (!%p450_p7)
}
  0xfd   :  { %s482_s22 = smov 128   ;;  %s483_s23 = smov 8   ;;  %v285_v0 = vmul.f32 %v206_v49, %v206_v49  ;;  %v299_v1 = vadd.f32 %v298_v63, %v284_v61  ;;  %v263_v2 = vadd.f32 %v262_v62, %v206_v49  ;;  %v286_v3 = vmul.f32 %v559_v22, %v559_v22  ;;  %v315_v40 = vld [vmem:[#allocation4] sm:$0x3] }
  0xfe   :  { %331 = dma.vmem_to_hbm [thread:$0]  %s326_s2, 2048, %s614_s3, [#allocation3], %s482_s22, %s482_s22, %s483_s23   ;;  %v287_v8 = vmul.f32 %v565_v29, %v565_v29  ;;  %v288_v9 = vmul.f32 %v557_v18, %v557_v18  ;;  %v289_v12 = vmul.f32 %v562_v26, %v562_v26  ;;  %v290_v15 = vmul.f32 %v227_v47, %v227_v47 }
  0xff   :  { %v264_v4 = vadd.f32 %v263_v2, %v559_v22  ;;  %v300_v5 = vadd.f32 %v299_v1, %v285_v0  ;;  %v291_v21 = vmul.f32 %v230_v57, %v230_v57  ;;  %v292_v22 = vmul.f32 %v569_v41, %v569_v41  ;;  %s484_s3 = smov [#allocation4]  }
 0x100   :  { %vm316_vm1 = vcmask 1040384   ;;  %s338_s26 = sshll.u32 %s484_s3, 4  ;;  %s339_s26 = int_to_ptr.vmem [resolvable:$true] %s338_s26 }
 0x101   :  { %v301_v6 = vadd.f32 %v300_v5, %v286_v3  ;;  %v265_v7 = vadd.f32 %v264_v4, %v565_v29  ;;  %s454_s27 = scalar_lea.vmem %s339_s26, 32  ;;  %p459_p9 = scmp.lt.s32.totalorder %s339_s26, %s339_s26 }
 0x102   :  { %p455_p8 = scmp.ne.s32.totalorder %s339_s26, %s454_s27  ;;  %p460_p10 = scmp.lt.s32.totalorder %s454_s27, %s454_s27 }
 0x103   :  { %v266_v10 = vadd.f32 %v265_v7, %v557_v18  ;;  %v302_v11 = vadd.f32 %v301_v6, %v287_v8  ;;  %v293_v18 = vmul.f32 %v238_v51, %v238_v51 }
 0x104   :  { %p461_p11 = por %p460_p10, %p459_p9 }
 0x105   :  { %v303_v13 = vadd.f32 %v302_v11, %v288_v9  ;;  %v267_v14 = vadd.f32 %v266_v10, %v562_v26 }
 0x106   :  { %p462_p12 = pnand %p461_p11, %p455_p8 }
 0x107   :  { %v268_v16 = vadd.f32 %v267_v14, %v227_v47  ;;  %v304_v17 = vadd.f32 %v303_v13, %v289_v12 }
 0x109   :  { %v305_v19 = vadd.f32 %v304_v17, %v290_v15  ;;  %v269_v20 = vadd.f32 %v268_v16, %v230_v57 }
 0x10b   :  { %v270_v23 = vadd.f32 %v269_v20, %v569_v41  ;;  %v306_v24 = vadd.f32 %v305_v19, %v291_v21 }
 0x10d   :  { %v271_v25 = vadd.f32 %v270_v23, %v238_v51  ;;  %v307_v27 = vadd.f32 %v306_v24, %v292_v22 }
 0x10f   :  { %v272_v28 = vrot.slane %v271_v25, 4  ;;  %v308_v29 = vadd.f32 %v307_v27, %v293_v18 }
 0x111   :  { %v273_v30 = vadd.f32 %v272_v28, %v271_v25  ;;  %v309_v31 = vrot.slane %v308_v29, 4 }
 0x113   :  { %v274_v26 = vrot.slane %v273_v30, 2  ;;  %v310_v32 = vadd.f32 %v309_v31, %v308_v29 }
 0x115   :  { %v275_v33 = vadd.f32 %v274_v26, %v273_v30  ;;  %v311_v34 = vrot.slane %v310_v32, 2 }
 0x117   :  { %v276_v35 = vrot.slane %v275_v33, 1  ;;  %v312_v36 = vadd.f32 %v311_v34, %v310_v32 }
 0x119   :  { %v313_v37 = vrot.slane %v312_v36, 1  ;;  %v277_v38 = vadd.f32 %v276_v35, %v275_v33 }
 0x11b   :  { %v314_v39 = vadd.f32 %v313_v37, %v312_v36 }
 0x11d   :  { %v317_v41 = vsel %vm316_vm1, %v277_v38, %v314_v39 }
 0x11e   :  { %v318_v42 = vadd.f32 %v317_v41, %v315_v40 }
 0x120   :  { %319 = vst [vmem:[#allocation4] sm:$0x3] %v318_v42 }
 0x121   :  { %465 = shalt.err (!%p462_p12)
}
 0x122   :  { %s466_s1 = scalar_lea.hbm %s615_s4, 32 }
 0x123   :  { %p467_p13 = scmp.ne.s32.totalorder %s615_s4, %s466_s1  ;;  %p470_p0 = scmp.lt.u32.totalorder %s466_s1, %s615_s4 }
 0x125   :  { %p472_p1 = pnand %p470_p0, %p467_p13 }
 0x127   :  { %475 = shalt.err (!%p472_p1)
}
 0x128   :  { %341 = dma.vmem_to_hbm [thread:$0]  %s339_s26, 32, %s615_s4, [#allocation5]  }
 0x129   :  { %476 = dma.done.wait [#allocation3], 2048  }
 0x12a   :  { %477 = vsyncadd [#allocation3], 4294965248 }
 0x12b   :  { %478 = dma.done.wait [#allocation5], 32  }
 0x12c   :  { %479 = vsyncadd [#allocation5], 4294967264 }
 0x12d   :  { %348 = vsyncpa [#allocation3], 1 }
 0x12e   :  { %349 = vsyncpa [#allocation5], 1 }

</bundles_post_ra>
